<compile_context>
chip_gen: v6e
topology: v6e:2x2x1
jax: 0.10.0
libtpu: 0.0.40
codegen_flags: <defaults>
</compile_context>

<pallas_src>
import functools
import math

import jax
import jax.numpy as jnp
from jax import lax
from jax.experimental import pallas as pl
from jax.experimental.pallas import tpu as pltpu


def _hub_attention_kernel(xkv_ref, wq_ref, bq_ref,
                          ctx_ref, probs_ref, scores_ref,
                          *, tq, s_valid, s_pad):
    # One grid step == (one batch element, one query tile).
    row0 = pl.multiple_of(pl.program_id(1) * tq, tq)

    xkv = xkv_ref[0]                              # (S_pad, H)  K == V == hidden_states
    xq = xkv_ref[0, pl.ds(row0, tq), :]           # (TQ, H)     query rows (VMEM slice,
                                                  #              no extra HBM DMA)
    wq = wq_ref[...]                              # (H, H)  pre-transposed, pre-scaled
    bq = bq_ref[...]                              # (1, H)  f32 pre-scaled bias

    # Q_scaled = x @ (Wq^T / sqrt(H)) + bq / sqrt(H)      (MXU, f32 accumulate)
    q = jnp.dot(xq, wq, preferred_element_type=jnp.float32) + bq          # (TQ, H)

    # attention_scores = Q_scaled @ K^T — contract last dim of both (no K^T copy).
    scores = lax.dot_general(
        q.astype(xkv.dtype), xkv,
        dimension_numbers=(((1,), (1,)), ((), ())),
        preferred_element_type=jnp.float32)                               # (TQ, S_pad)
    scores_ref[0] = scores.astype(scores_ref.dtype)

    # Mask padded key columns out of the softmax (static branch; exact for valid region).
    if s_valid < s_pad:
        col = lax.broadcasted_iota(jnp.int32, scores.shape, 1)
        scores = jnp.where(col < s_valid, scores, -jnp.inf)

    # softmax over last dim; only one (TQ, S_pad) value live at a time.
    m = jnp.max(scores, axis=-1, keepdims=True)
    e = jnp.exp(scores - m)
    denom = jnp.sum(e, axis=-1, keepdims=True)
    probs = e * pl.reciprocal(denom, approx=False)     # exact divide: keeps 1e-5 parity
    probs_ref[0] = probs.astype(probs_ref.dtype)

    # context = probs @ V, V == x
    ctx_ref[0] = jnp.dot(probs.astype(xkv.dtype), xkv,
                         preferred_element_type=jnp.float32).astype(ctx_ref.dtype)


def _vmem_limit_bytes():
    """Scoped-VMEM request with headroom, derived from the chip's physical VMEM."""
    cap = None
    try:
        cap = getattr(pltpu.get_tpu_info(), "vmem_capacity_bytes", None)
    except Exception:
        cap = None
    if not cap:
        return 64 << 20                      # safe default (worked on v5e/v6e/v7x)
    # leave ~16 MiB headroom for compiler scratch / semaphores / pipeline buffers
    return int(max(32 << 20, min(cap - (16 << 20), 112 << 20)))


def _choose_tiling(S, H, vmem_bytes, kv_itemsize):
    """Returns (S_pad, TQ). For S<=256 keep the block == full array (no padding)."""
    if S <= 256:
        return S, S
    S_pad = ((S + 127) // 128) * 128         # lane-dense output stores, clean (8,128) tiles
    for tq in (512, 256, 128):
        if S_pad % tq:
            continue
        need = (2 * S_pad * H * kv_itemsize      # double-buffered KV block
                + 2 * H * H * kv_itemsize        # resident weights (double-buffered)
                + 2 * tq * H * 4                 # ctx output buffers
                + 4 * tq * S_pad * 4             # probs + scores output buffers
                + 4 * tq * S_pad * 4)            # live (TQ,S_pad) f32 temporaries
        if need <= int(vmem_bytes * 0.85):
            return S_pad, tq
    return S_pad, 128


def hub_attention(hidden_states, wq, bq, *, use_bf16=False):
    """hidden_states: (B, S, H) f32; wq: (H, H) torch-Linear (out,in) layout; bq: (H,) f32.

    use_bf16=True feeds the MXU bf16 operands (weights + KV pre-cast once in the wrapper)
    for ~2-4x matmul throughput; default False keeps exact f32 (1e-5) parity.
    """
    B, S, H = hidden_states.shape

    # Fold the 1/sqrt(head_size) scale into the projection; pre-transpose once in XLA.
    scale = 1.0 / math.sqrt(float(H))
    wq_s = (wq * scale).T                          # (H, H): q = x @ wq_s
    bq_s = (bq * scale).reshape(1, H).astype(jnp.float32)

    vmem_limit = _vmem_limit_bytes()
    kv_itemsize = 2 if use_bf16 else 4
    S_pad, TQ = _choose_tiling(S, H, vmem_limit, kv_itemsize)

    x = hidden_states
    if S_pad != S:
        x = jnp.pad(x, ((0, 0), (0, S_pad - S), (0, 0)))
    if use_bf16:
        # Hoisted casts: done once in XLA, halves KV/weight DMA and VMEM residency.
        x = x.astype(jnp.bfloat16)
        wq_s = wq_s.astype(jnp.bfloat16)

    kernel = functools.partial(_hub_attention_kernel, tq=TQ, s_valid=S, s_pad=S_pad)

    grid_spec = pltpu.PrefetchScalarGridSpec(
        num_scalar_prefetch=0,
        grid=(B, S_pad // TQ),
        in_specs=[
            pl.BlockSpec((1, S_pad, H), lambda b, qt: (b, 0, 0)),   # x (Q sliced inside; K == V)
            pl.BlockSpec((H, H), lambda b, qt: (0, 0)),             # Wq (resident; const index)
            pl.BlockSpec((1, H), lambda b, qt: (0, 0)),             # bq (resident; const index)
        ],
        out_specs=[
            pl.BlockSpec((1, TQ, H), lambda b, qt: (b, qt, 0)),     # context
            pl.BlockSpec((1, TQ, S_pad), lambda b, qt: (b, qt, 0)), # probs
            pl.BlockSpec((1, TQ, S_pad), lambda b, qt: (b, qt, 0)), # scores
        ],
    )

    ctx, probs, scores = pl.pallas_call(
        kernel,
        out_shape=(
            jax.ShapeDtypeStruct((B, S_pad, H), jnp.float32),
            jax.ShapeDtypeStruct((B, S_pad, S_pad), jnp.float32),
            jax.ShapeDtypeStruct((B, S_pad, S_pad), jnp.float32),
        ),
        grid_spec=grid_spec,
        compiler_params=pltpu.CompilerParams(
            dimension_semantics=("parallel", "parallel"),
            vmem_limit_bytes=vmem_limit,
        ),
    )(x, wq_s, bq_s)

    if S_pad != S:
        ctx = ctx[:, :S, :]
        probs = probs[:, :S, :S]
        scores = scores[:, :S, :S]

    # Re-insert the (size-1) head axis to match PyTorch output shapes.
    return ctx, probs.reshape(B, 1, S, S), scores.reshape(B, 1, S, S)


def _reference(hidden_states, wq, bq):
    # Pure-JAX reference for correctness checking.
    q = hidden_states @ wq.T + bq
    scale = 1.0 / math.sqrt(hidden_states.shape[-1])
    scores = jnp.einsum("bsh,bth->bst", q, hidden_states) * scale
    probs = jax.nn.softmax(scores, axis=-1)
    ctx = jnp.einsum("bst,bth->bsh", probs, hidden_states)
    B, S, _ = scores.shape
    return ctx, probs.reshape(B, 1, S, S), scores.reshape(B, 1, S, S)


if __name__ == "__main__":
    B, S, H = 2, 8, 32   # batch, seq, hidden  (num_attention_heads forced to 1)

    key = jax.random.PRNGKey(0)
    kx, kwq, kbq, kwk, kbk, kwv, kbv = jax.random.split(key, 7)

    hidden_states = jax.random.normal(kx, (B, S, H), dtype=jnp.float32)

    # Deterministic parameter init (torch nn.Linear-like uniform bounds).
    bound = 1.0 / math.sqrt(H)
    wq = jax.random.uniform(kwq, (H, H), minval=-bound, maxval=bound, dtype=jnp.float32)
    bq = jax.random.uniform(kbq, (H,), minval=-bound, maxval=bound, dtype=jnp.float32)
    # key/value Linears exist in the module's __init__ but are never used in the
    # self-attention forward path (K = V = hidden_states); initialized for fidelity only.
    wk = jax.random.uniform(kwk, (H, H), minval=-bound, maxval=bound, dtype=jnp.float32)
    bk = jax.random.uniform(kbk, (H,), minval=-bound, maxval=bound, dtype=jnp.float32)
    wv = jax.random.uniform(kwv, (H, H), minval=-bound, maxval=bound, dtype=jnp.float32)
    bv = jax.random.uniform(kbv, (H,), minval=-bound, maxval=bound, dtype=jnp.float32)

    # TODO(synk): attention_mask / head_mask / relative position embeddings /
    # cross-attention / past_key_value branches not exercised (defaults: None/'absolute').

    ctx, probs, scores = hub_attention(hidden_states, wq, bq, use_bf16=False)
    jax.block_until_ready((ctx, probs, scores))

    ctx_r, probs_r, scores_r = _reference(hidden_states, wq, bq)
    assert ctx.shape == (B, S, H)
    assert probs.shape == (B, 1, S, S)
    assert scores.shape == (B, 1, S, S)
    assert jnp.allclose(ctx, ctx_r, atol=1e-5, rtol=1e-5)
    assert jnp.allclose(probs, probs_r, atol=1e-5, rtol=1e-5)
    assert jnp.allclose(scores, scores_r, atol=1e-5, rtol=1e-5)

    print("KERNEL_OK")
</pallas_src>

<mosaic_0001>
module attributes {stable_mosaic.version = 11 : i64} {
  func.func @_hub_attention_kernel(%arg0: i32, %arg1: i32, %arg2: memref<1x8x32xf32, #tpu.memory_space<vmem>>, %arg3: memref<32x32xf32, #tpu.memory_space<vmem>>, %arg4: memref<1x32xf32, #tpu.memory_space<vmem>>, %arg5: memref<1x8x32xf32, #tpu.memory_space<vmem>>, %arg6: memref<1x8x8xf32, #tpu.memory_space<vmem>>, %arg7: memref<1x8x8xf32, #tpu.memory_space<vmem>>) attributes {dimension_semantics = [#tpu.dimension_semantics<parallel>, #tpu.dimension_semantics<parallel>], iteration_bounds = array<i64: 2, 1>, scalar_prefetch = 0 : i64, scratch_operands = 0 : i64, tpu.core_type = #tpu.core_type<tc>, window_params = [{transform_indices = @transform_0, window_bounds = array<i64: 1, 8, 32>}, {pipeline_mode = #tpu.pipeline_mode<synchronous>, transform_indices = @transform_1, window_bounds = array<i64: 32, 32>}, {pipeline_mode = #tpu.pipeline_mode<synchronous>, transform_indices = @transform_2, window_bounds = array<i64: 1, 32>}, {transform_indices = @transform_3, window_bounds = array<i64: 1, 8, 32>}, {transform_indices = @transform_4, window_bounds = array<i64: 1, 8, 8>}, {transform_indices = @transform_5, window_bounds = array<i64: 1, 8, 8>}]} {
    %c8_i32 = arith.constant 8 : i32
    %0 = arith.muli %arg1, %c8_i32 : i32
    %1 = tpu.assume_multiple %0, 8 : i32
    %c0 = arith.constant 0 : index
    %c0_0 = arith.constant 0 : index
    %c0_1 = arith.constant 0 : index
    %2 = vector.load %arg2[%c0, %c0_0, %c0_1] : memref<1x8x32xf32, #tpu.memory_space<vmem>>, vector<1x8x32xf32>
    %3 = vector.shape_cast %2 : vector<1x8x32xf32> to vector<8x32xf32>
    %c0_2 = arith.constant 0 : index
    %4 = arith.index_cast %1 : i32 to index
    %c0_3 = arith.constant 0 : index
    %5 = vector.load %arg2[%c0_2, %4, %c0_3] : memref<1x8x32xf32, #tpu.memory_space<vmem>>, vector<1x8x32xf32>
    %6 = vector.shape_cast %5 : vector<1x8x32xf32> to vector<8x32xf32>
    %c0_4 = arith.constant 0 : index
    %c0_5 = arith.constant 0 : index
    %7 = vector.load %arg3[%c0_4, %c0_5] : memref<32x32xf32, #tpu.memory_space<vmem>>, vector<32x32xf32>
    %c0_6 = arith.constant 0 : index
    %c0_7 = arith.constant 0 : index
    %8 = vector.load %arg4[%c0_6, %c0_7] : memref<1x32xf32, #tpu.memory_space<vmem>>, vector<1x32xf32>
    %cst = arith.constant dense<0.000000e+00> : vector<8x32xf32>
    %9 = tpu.matmul %6, %7, %cst {dimension_numbers = #tpu.dot_dimension_numbers<[1], [0], [0], [1], [0, 0, 1, 1], [], []>} : vector<8x32xf32>, vector<32x32xf32>, vector<8x32xf32> -> vector<8x32xf32>
    %10 = vector.broadcast %8 : vector<1x32xf32> to vector<8x32xf32>
    %11 = arith.addf %9, %10 : vector<8x32xf32>
    %cst_8 = arith.constant dense<0.000000e+00> : vector<8x8xf32>
    %12 = tpu.matmul %11, %3, %cst_8 {dimension_numbers = #tpu.dot_dimension_numbers<[1], [1], [0], [0], [0, 0, 1, 0], [], []>} : vector<8x32xf32>, vector<8x32xf32>, vector<8x8xf32> -> vector<8x8xf32>
    %c0_9 = arith.constant 0 : index
    %c0_10 = arith.constant 0 : index
    %c0_11 = arith.constant 0 : index
    %13 = vector.load %arg7[%c0_9, %c0_10, %c0_11] : memref<1x8x8xf32, #tpu.memory_space<vmem>>, vector<1x8x8xf32>
    %14 = vector.shape_cast %13 : vector<1x8x8xf32> to vector<8x8xf32>
    %15 = vector.shape_cast %12 : vector<8x8xf32> to vector<1x8x8xf32>
    tpu.vector_store %arg7[%c0_9, %c0_10, %c0_11], %15 {strides = array<i32>} : memref<1x8x8xf32, #tpu.memory_space<vmem>>, vector<1x8x8xf32>,
    %cst_12 = arith.constant dense<0xFF800000> : vector<8xf32>
    %16 = vector.multi_reduction <maximumf>, %12, %cst_12 [1] : vector<8x8xf32> to vector<8xf32>
    %17 = vector.shape_cast %16 : vector<8xf32> to vector<8x1xf32>
    %18 = vector.broadcast %17 : vector<8x1xf32> to vector<8x8xf32>
    %19 = arith.subf %12, %18 : vector<8x8xf32>
    %20 = math.exp %19 : vector<8x8xf32>
    %cst_13 = arith.constant dense<0.000000e+00> : vector<8xf32>
    %21 = vector.multi_reduction <add>, %20, %cst_13 [1] : vector<8x8xf32> to vector<8xf32>
    %22 = vector.shape_cast %21 : vector<8xf32> to vector<8x1xf32>
    %23 = tpu.reciprocal %22 : vector<8x1xf32> -> vector<8x1xf32>
    %24 = vector.broadcast %23 : vector<8x1xf32> to vector<8x8xf32>
    %25 = arith.mulf %20, %24 : vector<8x8xf32>
    %c0_14 = arith.constant 0 : index
    %c0_15 = arith.constant 0 : index
    %c0_16 = arith.constant 0 : index
    %26 = vector.load %arg6[%c0_14, %c0_15, %c0_16] : memref<1x8x8xf32, #tpu.memory_space<vmem>>, vector<1x8x8xf32>
    %27 = vector.shape_cast %26 : vector<1x8x8xf32> to vector<8x8xf32>
    %28 = vector.shape_cast %25 : vector<8x8xf32> to vector<1x8x8xf32>
    tpu.vector_store %arg6[%c0_14, %c0_15, %c0_16], %28 {strides = array<i32>} : memref<1x8x8xf32, #tpu.memory_space<vmem>>, vector<1x8x8xf32>,
    %cst_17 = arith.constant dense<0.000000e+00> : vector<8x32xf32>
    %29 = tpu.matmul %25, %3, %cst_17 {dimension_numbers = #tpu.dot_dimension_numbers<[1], [0], [0], [1], [0, 0, 1, 1], [], []>} : vector<8x8xf32>, vector<8x32xf32>, vector<8x32xf32> -> vector<8x32xf32>
    %c0_18 = arith.constant 0 : index
    %c0_19 = arith.constant 0 : index
    %c0_20 = arith.constant 0 : index
    %30 = vector.load %arg5[%c0_18, %c0_19, %c0_20] : memref<1x8x32xf32, #tpu.memory_space<vmem>>, vector<1x8x32xf32>
    %31 = vector.shape_cast %30 : vector<1x8x32xf32> to vector<8x32xf32>
    %32 = vector.shape_cast %29 : vector<8x32xf32> to vector<1x8x32xf32>
    tpu.vector_store %arg5[%c0_18, %c0_19, %c0_20], %32 {strides = array<i32>} : memref<1x8x32xf32, #tpu.memory_space<vmem>>, vector<1x8x32xf32>,
    return
  }
  func.func @transform_0(%arg0: i32, %arg1: i32) -> (i32, i32, i32) {
    %c0_i32 = arith.constant 0 : i32
    %c0_i32_0 = arith.constant 0 : i32
    %c0_i32_1 = arith.constant 0 : i32
    return %arg0, %c0_i32, %c0_i32_0 : i32, i32, i32
  }
  func.func @transform_1(%arg0: i32, %arg1: i32) -> (i32, i32) {
    %c0_i32 = arith.constant 0 : i32
    %c0_i32_0 = arith.constant 0 : i32
    %c0_i32_1 = arith.constant 0 : i32
    return %c0_i32, %c0_i32_0 : i32, i32
  }
  func.func @transform_2(%arg0: i32, %arg1: i32) -> (i32, i32) {
    %c0_i32 = arith.constant 0 : i32
    %c0_i32_0 = arith.constant 0 : i32
    %c0_i32_1 = arith.constant 0 : i32
    return %c0_i32, %c0_i32_0 : i32, i32
  }
  func.func @transform_3(%arg0: i32, %arg1: i32) -> (i32, i32, i32) {
    %c0_i32 = arith.constant 0 : i32
    %c0_i32_0 = arith.constant 0 : i32
    return %arg0, %arg1, %c0_i32 : i32, i32, i32
  }
  func.func @transform_4(%arg0: i32, %arg1: i32) -> (i32, i32, i32) {
    %c0_i32 = arith.constant 0 : i32
    %c0_i32_0 = arith.constant 0 : i32
    return %arg0, %arg1, %c0_i32 : i32, i32, i32
  }
  func.func @transform_5(%arg0: i32, %arg1: i32) -> (i32, i32, i32) {
    %c0_i32 = arith.constant 0 : i32
    %c0_i32_0 = arith.constant 0 : i32
    return %arg0, %arg1, %c0_i32 : i32, i32, i32
  }
}

</mosaic_0001>

<bundles_post_ra>
// kernel: tpu_custom_call.1
= control target key start
LH: loop header
LB: loop body
LE: loop exit
PB: predicated region body
PF: predicated region fallthrough
CT: control target
= control target key end

     0   :  { %s1379_s0 = inlined_call_operand.hbm [shape: f32[2,8,32], index: 0, kind: input, shape index: {}]   ;;  %s1380_s1 = inlined_call_operand.hbm [shape: f32[32,32], index: 1, kind: input, shape index: {}]   ;;  %s1381_s2 = inlined_call_operand.vmem [shape: f32[1,32], index: 2, kind: input, shape index: {}]   ;;  %s1382_s3 = inlined_call_operand.hbm [shape: f32[2,8,32], index: 3, kind: output, shape index: {0}]   ;;  %s1383_s4 = inlined_call_operand.hbm [shape: f32[2,8,8], index: 4, kind: output, shape index: {1}]   ;;  %s1384_s5 = inlined_call_operand.hbm [shape: f32[2,8,8], index: 5, kind: output, shape index: {2}]  }
   0x1   :  { %1388 = sst [smem:[#allocation16_spill]] %s1380_s1 }
   0x2   :  { %11 = vsyncpa [#allocation3], 0 }
   0x3   :  { %13 = vsyncpa [#allocation3 + $0x1], 0 }
   0x4   :  { %14 = vsyncpa [#allocation6], 0 }
   0x5   :  { %15 = vsyncpa [#allocation4], 0 }
   0x6   :  { %17 = vsyncpa [#allocation4 + $0x1], 0 }
   0x7   :  { %18 = vsyncpa [#allocation9], 0 }
   0x8   :  { %20 = vsyncpa [#allocation9 + $0x1], 0  ;;  %s1133_s18 = smov 0   ;;  %s1135_s19 = smov 0  }
   0x9   :  { %s1137_s20 = smov 0   ;;  %s1139_s21 = smov 0  }
   0xa   :  { %s1141_s22 = smov 0   ;;  %s1143_s23 = smov 0  }
   0xb LB: > { %s1164_s24 = sadd.s32 4294967295, %s1092_s23   ;;  %s1385_s25 = sadd.s32 4294967294, %s1092_s23   ;;  %s1092_s23 = sphi %s1143_s23, %s26_s23   ;;  %s1088_s22 = sphi %s1141_s22, %s1409_s22   ;;  %s1084_s21 = sphi %s1139_s21, %s1408_s21   ;;  %s1080_s20 = sphi %s1137_s20, %s1407_s20   ;;  %s1076_s19 = sphi %s1135_s19, %s1406_s19   ;;  %s1072_s18 = sphi %s1133_s18, %s1405_s18  }
   0xc   : > { %p58_p0 = scmp.ne.s32.totalorder %s1076_s19, %s1072_s18  ;;  %p1387_p1 = scmp.eq.s32.totalorder %s1164_s24, 0 }
   0xd   : > { %p132_p3 = scmp.eq.s32.totalorder %s1385_s25, 1  ;;  %p753_p5 = scmp.ge.s32.totalorder %s1092_s23, 1 }
   0xe   : > { %p1175_p4 = por %p1387_p1, %p58_p0  ;;  %p195_p7 = scmp.lt.s32.totalorder %s1092_s23, 3 }
   0xf   : > { %p1180_p6 = por %p132_p3, %p58_p0  ;;  %s1094_s29 = smov [#allocation5]  }
  0x10   : > { %p1185_p8 = pnand %p753_p5, %p195_p7  ;;  %s207_s30 = sshll.u32 %s1094_s29, 4  ;;  %s208_s30 = int_to_ptr.vmem [resolvable:$true] %s207_s30 }
  0x11   : > { %s1390_s27 = scalar_select %p1180_p6, 1, 0 }
  0x12   : > { %p819_p9 = pneg %p1185_p8  ;;  %s38_s7 = sadd.s32 1, %s1088_s22 }
  0x13   : > { %s909_s8 = scalar_lea.vmem %s208_s30, 512  ;;  %p917_p5 = scmp.lt.s32.totalorder %s208_s30, %s208_s30 }
  0x14   : > { %p1194_p11 = pnand %p819_p9, %p1387_p1  ;;  %p910_p13 = scmp.ne.s32.totalorder %s208_s30, %s909_s8 }
  0x15   : > { %p918_p7 = scmp.lt.s32.totalorder %s909_s8, %s909_s8 }
  0x16   : > { %p900_p12 = pneg %p1194_p11 }
  0x17   : > { %p919_p2 = por %p918_p7, %p917_p5 }
  0x18   : > { %p912_p0 = pnand %p910_p13, %p900_p12 }
  0x1a   : > { %p913_p3 = pneg %p912_p0 }
  0x1c   : > { %p920_p6 = pnand %p919_p2, %p913_p3 }
  0x1e   : > { %923 = shalt.err (!%p920_p6)
}
  0x1f   : > { %s1095_s9 = smov 128   ;;  %s1096_s10 = smov 8  }
  0x20   : > { %s1393_s1 = sld [smem:[#allocation16_spill]]  ;;  %p40_p2 = scmp.ge.s32.totalorder %s38_s7, 2 }
  0x21   : > { %s45_s13 = sadd.s32 1, %s1080_s20  ;;  %p52_p6 = scmp.ne.s32.totalorder %s1080_s20, %s1076_s19 }
  0x22   : > { %p53_p9 = scmp.eq.s32.totalorder %s1092_s23, 0  ;;  %s1411_s7 = smov (%p40_p2, %s38_s7), 0 }
  0x23   : > { %1394 = sst [smem:[#allocation15_spill]] %s1411_s7  ;;  %p1396_p13 = scmp.eq.s32.totalorder %s1164_s24, 1 }
  0x24   : > { %p1212_p12 = por %p53_p9, %p52_p6  ;;  %s42_s16 = ssub.s32 %s1088_s22, %s1411_s7 }
  0x25   : > { %p1218_p0 = por %p1396_p13, %p52_p6  ;;  %p838_p3 = scmp.lt.s32.totalorder %s1092_s23, 2 }
  0x26   : > { %822 = dma.hbm_to_vmem [thread:$0]  (!%p1194_p11), %s1393_s1, 512, %s208_s30, [#allocation6], %s1095_s9, %s1095_s9, %s1096_s10  }
  0x27   : > { %p43_p11 = scmp.eq.s32.totalorder %s42_s16, 0  ;;  %s224_s17 = sand.u32 1, %s1080_s20  }
  0x28   : > { %s756_s29 = sshll.u32 %s224_s17, 3  ;;  %s757_s6 = sshll.u32 %s1088_s22, 7 }
  0x29   : > { %s1227_s30 = scalar_select %p43_p11, %s1080_s20, %s45_s13  }
  0x2a   : > { %s233_s10 = scalar_lea.hbm %s1379_s0, %s757_s6  ;;  %s228_s11 = scalar_lea.vmem [#allocation2], %s756_s29 }
  0x2b   : > { %s235_s12 = sshll.u32 %s228_s11, 4  ;;  %p1235_p5 = pnand %p838_p3, %p1212_p12  ;;  %s236_s12 = int_to_ptr.vmem [resolvable:$true] %s235_s12 }
  0x2c   : > { %s225_s1 = scalar_lea.sflag [#allocation3], %s224_s17  ;;  %s937_s16 = scalar_lea.vmem %s236_s12, 128 }
  0x2d   : > { %p926_p7 = pneg %p1235_p5  ;;  %p938_p2 = scmp.ne.s32.totalorder %s236_s12, %s937_s16 }
  0x2e   : > { %s1097_s13 = smov [#allocation2]  }
  0x2f   : > { %p940_p6 = pnand %p938_p2, %p926_p7  ;;  %s942_s7 = sshll.u32 %s1097_s13, 4  ;;  %s943_s7 = int_to_ptr.vmem [resolvable:$false] %s942_s7 }
  0x30   : > { %s944_s6 = scalar_lea.vmem %s943_s7, 256  ;;  %p945_p13 = scmp.lt.s32.totalorder %s236_s12, %s943_s7 }
  0x31   : > { %p941_p9 = pneg %p940_p6  ;;  %p946_p11 = scmp.lt.s32.totalorder %s944_s6, %s937_s16 }
  0x33   : > { %p947_p10 = por %p946_p11, %p945_p13 }
  0x35   : > { %p948_p1 = pnand %p947_p10, %p941_p9 }
  0x37   : > { %951 = shalt.err (!%p948_p1)
}
  0x38   : > { %826 = dma.hbm_to_vmem [thread:$0]  (!%p1235_p5), %s233_s10, 128, %s236_s12, %s225_s1  }
  0x39   : > { %244 = sbr.rel (%p1185_p8) target bundleno = 983 (0x3d7), region = 32  ;;  %s1246_s14 = sand.u32 (!%p1185_p8), 1, %s1076_s19  }
  0x3a   : > { %s1249_s17 = sshll.u32 (!%p1185_p8), %s1246_s14, 3  ;;  %s247_s7 = scalar_lea.sflag (!%p1185_p8), [#allocation3], %s1246_s14 }
  0x3b   : > { %s250_s29 = scalar_lea.vmem (!%p1185_p8), [#allocation2], %s1249_s17 }
  0x3e   : > { %1055 = dma.done.wait (%p1175_p4), %s247_s7, 128  }
  0x3f   : > { %1057 = vsyncadd (%p1175_p4), %s247_s7, 4294967168  ;;  %p1399_p1 = scmp.eq.s32.totalorder %s1164_s24, 0 }
  0x41   : > { %1059 = dma.done.wait (%p1399_p1), [#allocation6], 512   ;;  %p1400_p8 = pmov %p1399_p1 }
  0x42   : > { %v1098_v0 = vmov 0.0   ;;  %vm1099_vm0 = vmmov 0   ;;  %v298_v1 = vld [vmem:[#allocation5 + $0x18] sm:$0xff]  ;;  %v297_v2 = vld [vmem:[#allocation5 + $0x10] sm:$0xff]  ;;  %vm306_vm1 = vcmask 261120   ;;  %v296_v4 = vld [vmem:[#allocation5 + $0x8] sm:$0xff] }
  0x43   : > { %1061 = vsyncadd (%p1400_p8), [#allocation6], 4294966784  ;;  %786 = vmatprep.subr.mxu0 %v1098_v0  ;;  %794 = vmatprep.mubr.msk.f32.mxu0 %vm1099_vm0, %v1098_v0  ;;  %v294_v3 = vld [vmem:[%s250_s29] sm:$0xff]  ;;  %v295_v5 = vld [vmem:[#allocation5] sm:$0xff]  ;;  %vm456_vm2 = vcmask 64512   ;;  %s290_s26 = scalar_lea.vmem [#allocation10], %s1249_s17 }
  0x44   : > { %797 = vmatprep.subr.mxu1 %v1098_v0  ;;  %799 = vmatprep.mubr.msk.f32.mxu1 %vm1099_vm0, %v1098_v0  ;;  %v764_v6 = vld [vmem:[%s1381_s2] ss:$0 sm:$0xff]  ;;  %s283_s28 = scalar_lea.vmem [#allocation8], %s1249_s17  ;;  %s549_s8 = sand.u32 1, %s1164_s24  }
  0x45   : > { %787 = vmatpush3.msra.mxu0 %v298_v1  ;;  %798 = vmatpush3.xpose.msk.msra.mxu1 %vm306_vm1, %v294_v3  ;;  %s1279_s9 = sshll.u32 %s1084_s21, 7  ;;  %s583_s16 = sshll.u32 %s283_s28, 4  ;;  %s584_s16 = int_to_ptr.vmem [resolvable:$true] %s583_s16 }
  0x46   : > { %788 = vmatprep.subr.mxu0 %v1098_v0  ;;  %802 = vmatprep.subr.mxu1 %v1098_v0  ;;  %s1285_s12 = scalar_lea.hbm %s1383_s4, %s1279_s9  ;;  %s597_s13 = sshll.u32 %s290_s26, 4  ;;  %s598_s13 = int_to_ptr.vmem [resolvable:$true] %s597_s13 }
  0x47   : > { %789 = vmatpush3.msra.mxu0 %v297_v2  ;;  %s1287_s6 = scalar_lea.sflag [#allocation9], %s549_s8  ;;  %s952_s7 = scalar_lea.vmem %s584_s16, 128 }
  0x48   : > { %790 = vmatprep.subr.mxu0 %v1098_v0  ;;  %p953_p4 = scmp.ne.s32.totalorder %s584_s16, %s952_s7  ;;  %s1100_s29 = smov [#allocation8]  }
  0x49   : > { %791 = vmatpush3.msra.mxu0 %v296_v4  ;;  %s956_s24 = sshll.u32 %s1100_s29, 4  ;;  %s957_s24 = int_to_ptr.vmem [resolvable:$false] %s956_s24 }
  0x4a   : > { %792 = vmatprep.subr.mxu0 %v1098_v0  ;;  %p954_p10 = pnand %p953_p4, %p1218_p0  ;;  %s958_s21 = scalar_lea.vmem %s957_s24, 256 }
  0x4b   : > { %793 = vmatpush3.msra.mxu0 %v295_v5  ;;  %p959_p3 = scmp.lt.s32.totalorder %s584_s16, %s957_s24  ;;  %p960_p5 = scmp.lt.s32.totalorder %s958_s21, %s952_s7 }
  0x4c   : > { %795 = vmatmul.mubr.msk.f32.vlgmr.msra.gmra.mxu0 %vm306_vm1, %v294_v3  ;;  %p955_p12 = pneg %p954_p10 }
  0x4d   : > { %p961_p7 = por %p960_p5, %p959_p3 }
  0x4f   : > { %p962_p2 = pnand %p961_p7, %p955_p12 }
 0x10c   : > { %v376_v7 = vpop.f32.mrf.mxu0 }
 0x10d   : > { %v377_v8 = vadd.f32 %v764_v6, %v376_v7 }
 0x10e   : > { %v796_v9 = vpop.f32.mrf.mxu0 }
 0x10f   : > { %800 = vmatmul.mubr.msk.f32.vlgmr.msra.gmra.mxu1 %vm306_vm1, %v377_v8 }
 0x110   : > { %803 = vmatpush3.msra.mxu1 %v294_v3  ;;  %804 = vmatprep.mubr.msk.f32.mxu1 %vm1099_vm0, %v1098_v0 }
 0x1cf   : > { %v452_v10 = vpop.f32.mrf.mxu1 }
 0x1d0   : > { %457 = vst.msk [vmem:[%s290_s26] sm:$0xff] %vm456_vm2, %v452_v10  ;;  %v458_v11 = vsel %vm456_vm2, %v452_v10, -inf }
 0x1d1   : > { %459 = vmax.xlane.f32.xlu0 %v458_v11  ;;  %v801_v12 = vpop.f32.mrf.mxu1 }
 0x25a   : > { %v460_v13 = vpop.xlane.xlu0 %459 }
 0x25b   : > { %v461_v14 = vsub.f32 %v452_v10, %v460_v13 }
 0x25d   : > { %v462_v15 = vmul.f32 1.442695, %v461_v14 }
 0x25f   : > { %894 = vpow2.f32 %v462_v15 }
 0x26c   : > { %v895_v16 = vpop.eup %894 }
 0x26d   : > { %v464_v17 = vsel %vm456_vm2, %v895_v16, 0.0 }
 0x26e   : > { %465 = vadd.xlane.f32.xlu0 %v464_v17 }
 0x2f7   : > { %v466_v18 = vpop.xlane.xlu0 %465 }
 0x2f8   : > { %896 = vrcp.f32 %v466_v18 }
 0x305   : > { %v897_v19 = vpop.eup %896 }
 0x306   : > { %v468_v20 = vmul.f32 %v897_v19, %v895_v16 }
 0x308   : > { %805 = vmatmul.mubr.msk.f32.vlgmr.msra.gmra.mxu1 %vm456_vm2, %v468_v20  ;;  %469 = vst.msk [vmem:[%s283_s28] sm:$0xff] %vm456_vm2, %v468_v20 }
 0x309   : > { %965 = shalt.err (!%p962_p2)
}
 0x30a   : > { %s966_s1 = scalar_lea.hbm %s1285_s12, 128  ;;  %s970_s28 = scalar_lea.hbm %s1383_s4, 256 }
 0x30b   : > { %p967_p6 = scmp.ne.s32.totalorder %s1285_s12, %s966_s1  ;;  %p971_p11 = scmp.lt.s32.totalorder %s1285_s12, %s1383_s4 }
 0x30c   : > { %p972_p1 = scmp.lt.s32.totalorder %s970_s28, %s966_s1 }
 0x30d   : > { %p968_p9 = pnand %p967_p6, %p1218_p0 }
 0x30e   : > { %p973_p8 = por %p972_p1, %p971_p11 }
 0x30f   : > { %p969_p13 = pneg %p968_p9 }
 0x311   : > { %p974_p4 = pnand %p973_p8, %p969_p13 }
 0x313   : > { %977 = shalt.err (!%p974_p4)
}
 0x314   : > { %814 = dma.vmem_to_hbm [thread:$0]  (%p1218_p0), %s584_s16, 128, %s1285_s12, %s1287_s6  }
 0x315   : > { %s595_s29 = scalar_lea.hbm %s1384_s5, %s1279_s9  ;;  %s978_s24 = scalar_lea.vmem %s598_s13, 128 }
 0x316   : > { %p979_p10 = scmp.ne.s32.totalorder %s598_s13, %s978_s24  ;;  %s1101_s21 = smov [#allocation10]  }
 0x317   : > { %s982_s1 = sshll.u32 %s1101_s21, 4  ;;  %s983_s1 = int_to_ptr.vmem [resolvable:$false] %s982_s1 }
 0x318   : > { %p980_p12 = pnand %p979_p10, %p1218_p0  ;;  %s984_s25 = scalar_lea.vmem %s983_s1, 256 }
 0x319   : > { %p985_p5 = scmp.lt.s32.totalorder %s598_s13, %s983_s1  ;;  %p986_p7 = scmp.lt.s32.totalorder %s984_s25, %s978_s24 }
 0x31a   : > { %p981_p3 = pneg %p980_p12 }
 0x31b   : > { %p987_p2 = por %p986_p7, %p985_p5 }
 0x31d   : > { %p988_p6 = pnand %p987_p2, %p981_p3 }
 0x31f   : > { %991 = shalt.err (!%p988_p6)
}
 0x320   : > { %s992_s12 = scalar_lea.hbm %s595_s29, 128  ;;  %s996_s28 = scalar_lea.hbm %s1384_s5, 256 }
 0x321   : > { %p993_p9 = scmp.ne.s32.totalorder %s595_s29, %s992_s12  ;;  %p997_p1 = scmp.lt.s32.totalorder %s595_s29, %s1384_s5 }
 0x322   : > { %p998_p8 = scmp.lt.s32.totalorder %s996_s28, %s992_s12 }
 0x323   : > { %p994_p13 = pnand %p993_p9, %p1218_p0 }
 0x324   : > { %p999_p4 = por %p998_p8, %p997_p1 }
 0x325   : > { %p995_p11 = pneg %p994_p13 }
 0x327   : > { %p1000_p10 = pnand %p999_p4, %p995_p11 }
 0x329   : > { %1003 = shalt.err (!%p1000_p10)
}
 0x32a   : > { %815 = dma.vmem_to_hbm [thread:$0]  (%p1218_p0), %s598_s13, 128, %s595_s29, %s1287_s6  }
 0x32b   : > { %s276_s11 = scalar_lea.vmem [#allocation7], %s1249_s17  ;;  %s1328_s1 = scalar_lea.hbm %s1382_s3, %s1279_s9 }
 0x32c   : > { %s569_s7 = sshll.u32 %s276_s11, 4  ;;  %s545_s25 = scalar_lea.sflag [#allocation4], %s1246_s14  ;;  %s1330_s7 = int_to_ptr.vmem [resolvable:$true] %s569_s7 }
 0x32d   : > { %s1004_s12 = scalar_lea.vmem %s1330_s7, 128  ;;  %s1102_s17 = smov [#allocation7]  }
 0x32e   : > { %p1005_p12 = scmp.ne.s32.totalorder %s1330_s7, %s1004_s12  ;;  %s1008_s13 = sshll.u32 %s1102_s17, 4  ;;  %s1009_s13 = int_to_ptr.vmem [resolvable:$false] %s1008_s13 }
 0x32f   : > { %s1010_s9 = scalar_lea.vmem %s1009_s13, 256  ;;  %p1011_p7 = scmp.lt.s32.totalorder %s1330_s7, %s1009_s13 }
 0x330   : > { %p1006_p3 = pnand %p1005_p12, %p1218_p0  ;;  %p1012_p2 = scmp.lt.s32.totalorder %s1010_s9, %s1004_s12 }
 0x332   : > { %p1007_p5 = pneg %p1006_p3  ;;  %p1013_p6 = por %p1012_p2, %p1011_p7 }
 0x334   : > { %p1014_p9 = pnand %p1013_p6, %p1007_p5 }
 0x3c8   : > { %v539_v21 = vpop.f32.mrf.mxu1 }
 0x3c9   : > { %543 = vst.msk [vmem:[%s276_s11] sm:$0xff] %vm306_vm1, %v539_v21 }
 0x3ca   : > { %v806_v22 = vpop.f32.mrf.mxu1 }
 0x3cb   : > { %1017 = shalt.err (!%p1014_p9)
}
 0x3cc   : > { %s1018_s6 = scalar_lea.hbm %s1328_s1, 128  ;;  %s1022_s16 = scalar_lea.hbm %s1382_s3, 256 }
 0x3cd   : > { %p1019_p13 = scmp.ne.s32.totalorder %s1328_s1, %s1018_s6  ;;  %p1023_p8 = scmp.lt.s32.totalorder %s1328_s1, %s1382_s3 }
 0x3ce   : > { %p1024_p4 = scmp.lt.s32.totalorder %s1022_s16, %s1018_s6 }
 0x3cf   : > { %p1020_p11 = pnand %p1019_p13, %p1218_p0 }
 0x3d0   : > { %p1025_p10 = por %p1024_p4, %p1023_p8 }
 0x3d1   : > { %p1021_p1 = pneg %p1020_p11 }
 0x3d3   : > { %p1026_p12 = pnand %p1025_p10, %p1021_p1 }
 0x3d5   : > { %1029 = shalt.err (!%p1026_p12)
}
 0x3d6   : > { %813 = dma.vmem_to_hbm [thread:$0]  (%p1218_p0), %s1330_s7, 128, %s1328_s1, %s545_s25  }
 0x3d7 PF: > { %s609_s8 = sand.u32 1, %s1072_s18   ;;  %p1401_p3 = scmp.ne.s32.totalorder %s1390_s27, 0 }
 0x3d8   : > { %p1402_p5 = scmp.ge.s32.totalorder %s1092_s23, 2  ;;  %s610_s10 = scalar_lea.sflag [#allocation4], %s609_s8 }
 0x3da   : > { %p828_p7 = pnand %p1402_p5, %p1401_p3 }
 0x3dc   : > { %p829_p2 = pneg %p828_p7 }
 0x3de   : > { %1063 = dma.done.wait (%p829_p2), %s610_s10, 128  }
 0x3df   : > { %1065 = vsyncadd (%p829_p2), %s610_s10, 4294967168  ;;  %s1403_s11 = sadd.s32 4294967294, %s1092_s23  }
 0x3e0   : > { %s618_s24 = sand.u32 1, %s1403_s11  }
 0x3e1   : > { %s619_s21 = scalar_lea.sflag [#allocation9], %s618_s24 }
 0x3e2   : > { %1067 = dma.done.wait (%p829_p2), %s619_s21, 256  }
 0x3e3   : > { %1069 = vsyncadd (%p829_p2), %s619_s21, 4294967040  ;;  %s26_s23 = sadd.s32 1, %s1092_s23   ;;  %s1404_s27 = sld [smem:[#allocation15_spill]] }
 0x3e4   : > { %p23_p0 = scmp.ge.s32.totalorder %s26_s23, 4   ;;  %s1405_s18 = smov %s1076_s19 }
 0x3e5   : > { %s1406_s19 = smov %s1080_s20  ;;  %s1407_s20 = smov %s1227_s30 }
 0x3e6   : > { %s1408_s21 = smov %s1088_s22  ;;  %25 = sbr.rel (!%p23_p0) target bundleno = 11 (0xb), region = 114 }
 0x3e9   : > { %s1409_s22 = smov %s1404_s27 }
 0x3eb   :  { %633 = vsyncpa [#allocation3], 1 }
 0x3ec   :  { %635 = vsyncpa [#allocation3 + $0x1], 1 }
 0x3ed   :  { %636 = vsyncpa [#allocation6], 1 }
 0x3ee   :  { %637 = vsyncpa [#allocation4], 1 }
 0x3ef   :  { %639 = vsyncpa [#allocation4 + $0x1], 1 }
 0x3f0   :  { %640 = vsyncpa [#allocation9], 1 }
 0x3f1   :  { %642 = vsyncpa [#allocation9 + $0x1], 1 }

</bundles_post_ra>
